<compile_context>
chip_gen: v5e
topology: v5e:2x2
jax: 0.10.0
libtpu: 0.0.40
codegen_flags: <defaults>
</compile_context>

<pallas_src>
import functools
import math

import jax
import jax.numpy as jnp
from jax.experimental import pallas as pl
from jax.experimental.pallas import tpu as pltpu

MAX_PERIOD = 10000.0


def _round_up(x, m):
    return (x + m - 1) // m * m


def _vmem_cap_bytes():
    """0.75 * physical per-core VMEM, with a conservative fallback."""
    try:
        cap = int(pltpu.get_tpu_info().vmem_capacity_bytes)
    except Exception:
        cap = 64 << 20
    return int(cap * 0.75)


def _default_bf16_silu():
    """bf16 VPU/EUP exists on v6e/v7x; keep f32 elementwise on v4/v5."""
    try:
        kind = jax.devices()[0].device_kind.lower()
    except Exception:
        return False
    if "v4" in kind or "v5" in kind:
        return False
    return True


def _block_spec(shape, index_map, buffer_count=None):
    """BlockSpec with optional single/multi-buffering (graceful fallback)."""
    if buffer_count is None:
        return pl.BlockSpec(shape, index_map)
    try:
        return pl.BlockSpec(shape, index_map, pipeline_mode=pl.Buffered(buffer_count))
    except TypeError:
        return pl.BlockSpec(shape, index_map)


def _pick_col_block(hp, max_w2_bytes):
    """Largest multiple of 128 dividing hp whose (hp, col) bf16 slab fits."""
    m = hp // 128
    best = 128
    for d in range(1, m + 1):
        if m % d == 0 and hp * (128 * d) * 2 <= max_w2_bytes:
            best = 128 * d
    return best


def _timestep_embedder_kernel(
    t_ref, freqs_ref, w1_ref, b1_ref, w2_ref, b2_ref, o_ref, *, bf16_silu
):
    # t_ref:     (tm, 1)       f32   (streamed row block of timesteps)
    # freqs_ref: (1, half)     f32   (resident, single-buffered)
    # w1_ref:    (FREQ, Hp)    bf16  (resident, single-buffered)
    # b1_ref:    (1, Hp)       f32   (resident, single-buffered)
    # w2_ref:    (Hp, tn)      bf16  (column block; resident if tn == Hp)
    # b2_ref:    (1, tn)       f32
    # o_ref:     (tm, tn)      out_dtype
    t = t_ref[...]                                    # (tm, 1) f32
    freqs = freqs_ref[...]                            # (1, half) f32

    args = t * freqs                                  # (tm, half) f32
    # half is a multiple of 128 for the standard FREQ=256 case -> lane-aligned concat.
    emb = jnp.concatenate([jnp.cos(args), jnp.sin(args)], axis=-1)
    emb = emb.astype(jnp.bfloat16)                    # (tm, FREQ)

    # Linear 1 (bf16 x bf16 -> f32 accumulate).
    h = jnp.dot(emb, w1_ref[...], preferred_element_type=jnp.float32) + b1_ref[...]

    # SiLU: bf16 on chips with bf16 VPU/EUP, f32 otherwise.
    if bf16_silu:
        hb = h.astype(jnp.bfloat16)
        hb = hb * jax.nn.sigmoid(hb)
    else:
        hb = (h * jax.nn.sigmoid(h)).astype(jnp.bfloat16)

    # Linear 2 (bf16 x bf16 -> f32 accumulate), column block of W2.
    out = jnp.dot(hb, w2_ref[...], preferred_element_type=jnp.float32) + b2_ref[...]
    o_ref[...] = out.astype(o_ref.dtype)


def prepare_timestep_embedder_params(w1, b1, w2, b2, *, max_period=MAX_PERIOD):
    """One-time weight prep (pad to lane-dense Hp, cast to bf16, build freqs).

    Call once at init; reuse the returned dict for every forward call so the
    per-call path contains no weight reads/writes.
    """
    freq_size, h = w1.shape
    assert freq_size % 2 == 0, "frequency_embedding_size must be even"
    # TODO(synk): odd frequency_embedding_size would need the zero-pad column branch.
    assert w2.shape == (h, h) and b1.shape == (h,) and b2.shape == (h,)
    half = freq_size // 2
    hp = _round_up(h, 128)

    freqs = jnp.exp(
        -math.log(max_period) * jnp.arange(half, dtype=jnp.float32) / half
    ).reshape(1, half)
    w1p = jnp.zeros((freq_size, hp), jnp.bfloat16).at[:, :h].set(w1.astype(jnp.bfloat16))
    w2p = jnp.zeros((hp, hp), jnp.bfloat16).at[:h, :h].set(w2.astype(jnp.bfloat16))
    b1p = jnp.zeros((1, hp), jnp.float32).at[0, :h].set(b1.astype(jnp.float32))
    b2p = jnp.zeros((1, hp), jnp.float32).at[0, :h].set(b2.astype(jnp.float32))

    return {
        "freqs": freqs, "w1": w1p, "b1": b1p, "w2": w2p, "b2": b2p,
        "h": h, "hp": hp, "freq_size": freq_size, "half": half,
    }


def timestep_embedder_apply(t, params, *, out_dtype=jnp.float32,
                            row_block=None, bf16_silu=None):
    """t: (N,) -> (N, H) in out_dtype, using pre-prepared params."""
    n = t.shape[0]
    h, hp = params["h"], params["hp"]
    freq_size, half = params["freq_size"], params["half"]

    if bf16_silu is None:
        bf16_silu = _default_bf16_silu()

    # Row tile over the batch: multiple of 8 (f32 sublane), up to 512.
    if row_block is None:
        if n >= 512:
            row_block = 512
        elif n >= 256:
            row_block = 256
        elif n >= 128:
            row_block = 128
        else:
            row_block = _round_up(max(n, 1), 8)
    n_pad = _round_up(n, row_block)
    num_row_blocks = n_pad // row_block

    # Column tile over W2's output columns (lane-dense, divides Hp).
    cap = _vmem_cap_bytes()
    col_block = _pick_col_block(hp, max_w2_bytes=cap // 3)
    num_col_blocks = hp // col_block

    # Per-call prep: only the (tiny) timestep vector is padded.
    t2 = jnp.zeros((n_pad, 1), jnp.float32).at[:n, 0].set(t.astype(jnp.float32))

    # VMEM budget: resident (single-buffered) weights + double-buffered streamed tiles.
    out_bytes = jnp.dtype(out_dtype).itemsize
    resident = (
        8 * _round_up(half, 128) * 4            # freqs
        + freq_size * hp * 2                    # W1 (bf16)
        + 8 * hp * 4                            # b1
    )
    w2_slab = hp * col_block * 2 + 8 * col_block * 4      # W2 col block + b2 col block
    streamed = (
        2 * _round_up(row_block, 8) * 128 * 4   # t tile (lane-padded), double-buffered
        + 2 * row_block * col_block * out_bytes # out tile, double-buffered
    )
    if num_col_blocks == 1:
        resident += w2_slab                     # W2/b2 fully resident
    else:
        streamed += 2 * w2_slab                 # W2/b2 streamed over columns
    vmem_bytes = min(max(resident + streamed + (4 << 20), 16 << 20), cap)

    w2_buffers = 1 if num_col_blocks == 1 else None  # None -> default double-buffer

    kernel = functools.partial(_timestep_embedder_kernel, bf16_silu=bf16_silu)

    out = pl.pallas_call(
        kernel,
        out_shape=jax.ShapeDtypeStruct((n_pad, hp), out_dtype),
        grid=(num_row_blocks, num_col_blocks),
        in_specs=[
            _block_spec((row_block, 1), lambda i, j: (i, 0)),                  # t rows
            _block_spec((1, half), lambda i, j: (0, 0), 1),                    # freqs
            _block_spec((freq_size, hp), lambda i, j: (0, 0), 1),              # W1
            _block_spec((1, hp), lambda i, j: (0, 0), 1),                      # b1
            _block_spec((hp, col_block), lambda i, j: (0, j), w2_buffers),     # W2 cols
            _block_spec((1, col_block), lambda i, j: (0, j), w2_buffers),      # b2 cols
        ],
        out_specs=pl.BlockSpec((row_block, col_block), lambda i, j: (i, j)),
        compiler_params=pltpu.CompilerParams(
            dimension_semantics=("parallel", "parallel"),
            vmem_limit_bytes=vmem_bytes,
        ),
    )(t2, params["freqs"], params["w1"], params["b1"], params["w2"], params["b2"])

    # Skip the (extra-copy) slice when no padding was applied.
    if n_pad == n and hp == h:
        return out
    return out[:n, :h]


def timestep_embedder(t, w1, b1, w2, b2, **kwargs):
    """Convenience one-shot wrapper (prefer prepare + apply for repeated calls)."""
    params = prepare_timestep_embedder_params(w1, b1, w2, b2)
    return timestep_embedder_apply(t, params, **kwargs)


def reference(t, w1, b1, w2, b2):
    freq_size = w1.shape[0]
    half = freq_size // 2
    freqs = jnp.exp(-math.log(MAX_PERIOD) * jnp.arange(half, dtype=jnp.float32) / half)
    args = t.astype(jnp.float32)[:, None] * freqs[None]
    emb = jnp.concatenate([jnp.cos(args), jnp.sin(args)], axis=-1)
    x = emb @ w1 + b1
    x = x * jax.nn.sigmoid(x)
    return x @ w2 + b2


if __name__ == "__main__":
    N = 8
    HIDDEN = 32
    FREQ_EMB = 256

    key = jax.random.PRNGKey(0)
    k_t, k_w1, k_b1, k_w2, k_b2 = jax.random.split(key, 5)

    # timesteps (possibly fractional)
    t = jax.random.uniform(k_t, (N,), dtype=jnp.float32) * 1000.0

    # deterministic synthetic parameters (already transposed vs torch Linear)
    w1 = jax.random.normal(k_w1, (FREQ_EMB, HIDDEN), dtype=jnp.float32) * 0.02
    b1 = jax.random.normal(k_b1, (HIDDEN,), dtype=jnp.float32) * 0.02
    w2 = jax.random.normal(k_w2, (HIDDEN, HIDDEN), dtype=jnp.float32) * 0.02
    b2 = jax.random.normal(k_b2, (HIDDEN,), dtype=jnp.float32) * 0.02

    # One-time weight prep (hoisted out of the per-call path), then apply.
    params = prepare_timestep_embedder_params(w1, b1, w2, b2)
    out = timestep_embedder_apply(t, params)
    out = jax.block_until_ready(out)

    ref = reference(t, w1, b1, w2, b2)
    assert out.shape == (N, HIDDEN)
    # bf16 weights/activations in the matmuls -> looser tolerance vs f32 reference.
    assert jnp.allclose(out, ref, atol=1e-2, rtol=1e-2), "mismatch vs reference"

    print("KERNEL_OK")
</pallas_src>

<mosaic_0001>
module attributes {stable_mosaic.version = 11 : i64} {
  func.func @_timestep_embedder_kernel(%arg0: i32, %arg1: i32, %arg2: memref<8x1xf32, #tpu.memory_space<vmem>>, %arg3: memref<1x128xf32, #tpu.memory_space<vmem>>, %arg4: memref<256x128xbf16, #tpu.memory_space<vmem>>, %arg5: memref<1x128xf32, #tpu.memory_space<vmem>>, %arg6: memref<128x128xbf16, #tpu.memory_space<vmem>>, %arg7: memref<1x128xf32, #tpu.memory_space<vmem>>, %arg8: memref<8x128xf32, #tpu.memory_space<vmem>>) attributes {dimension_semantics = [#tpu.dimension_semantics<parallel>, #tpu.dimension_semantics<parallel>], iteration_bounds = array<i64: 1, 1>, scalar_prefetch = 0 : i64, scratch_operands = 0 : i64, tpu.core_type = #tpu.core_type<tc>, window_params = [{transform_indices = @transform_0, window_bounds = array<i64: 8, 1>}, {pipeline_mode = #tpu.pipeline_mode<synchronous>, transform_indices = @transform_1, window_bounds = array<i64: 1, 128>}, {pipeline_mode = #tpu.pipeline_mode<synchronous>, transform_indices = @transform_2, window_bounds = array<i64: 256, 128>}, {pipeline_mode = #tpu.pipeline_mode<synchronous>, transform_indices = @transform_3, window_bounds = array<i64: 1, 128>}, {pipeline_mode = #tpu.pipeline_mode<synchronous>, transform_indices = @transform_4, window_bounds = array<i64: 128, 128>}, {pipeline_mode = #tpu.pipeline_mode<synchronous>, transform_indices = @transform_5, window_bounds = array<i64: 1, 128>}, {transform_indices = @transform_6, window_bounds = array<i64: 8, 128>}]} {
    %c0 = arith.constant 0 : index
    %c0_0 = arith.constant 0 : index
    %0 = vector.load %arg2[%c0, %c0_0] : memref<8x1xf32, #tpu.memory_space<vmem>>, vector<8x1xf32>
    %c0_1 = arith.constant 0 : index
    %c0_2 = arith.constant 0 : index
    %1 = vector.load %arg3[%c0_1, %c0_2] : memref<1x128xf32, #tpu.memory_space<vmem>>, vector<1x128xf32>
    %2 = vector.broadcast %0 : vector<8x1xf32> to vector<8x128xf32>
    %3 = vector.broadcast %1 : vector<1x128xf32> to vector<8x128xf32>
    %4 = arith.mulf %2, %3 : vector<8x128xf32>
    %5 = math.cos %4 : vector<8x128xf32>
    %6 = math.sin %4 : vector<8x128xf32>
    %7 = tpu.concatenate %5, %6 in 1 : vector<8x128xf32>, vector<8x128xf32> -> vector<8x256xf32>
    %8 = arith.truncf %7 : vector<8x256xf32> to vector<8x256xbf16>
    %c0_3 = arith.constant 0 : index
    %c0_4 = arith.constant 0 : index
    %9 = vector.load %arg4[%c0_3, %c0_4] : memref<256x128xbf16, #tpu.memory_space<vmem>>, vector<256x128xbf16>
    %cst = arith.constant dense<0.000000e+00> : vector<8x128xf32>
    %10 = tpu.matmul %8, %9, %cst {dimension_numbers = #tpu.dot_dimension_numbers<[1], [0], [0], [1], [0, 0, 1, 1], [], []>} : vector<8x256xbf16>, vector<256x128xbf16>, vector<8x128xf32> -> vector<8x128xf32>
    %c0_5 = arith.constant 0 : index
    %c0_6 = arith.constant 0 : index
    %11 = vector.load %arg5[%c0_5, %c0_6] : memref<1x128xf32, #tpu.memory_space<vmem>>, vector<1x128xf32>
    %12 = vector.broadcast %11 : vector<1x128xf32> to vector<8x128xf32>
    %13 = arith.addf %10, %12 : vector<8x128xf32>
    %14 = arith.truncf %13 : vector<8x128xf32> to vector<8x128xbf16>
    %15 = arith.negf %14 : vector<8x128xbf16>
    %16 = math.exp %15 : vector<8x128xbf16>
    %cst_7 = arith.constant 1.000000e+00 : bf16
    %17 = vector.broadcast %cst_7 : bf16 to vector<8x128xbf16>
    %18 = arith.addf %17, %16 : vector<8x128xbf16>
    %19 = arith.divf %17, %18 : vector<8x128xbf16>
    %20 = arith.mulf %14, %19 : vector<8x128xbf16>
    %c0_8 = arith.constant 0 : index
    %c0_9 = arith.constant 0 : index
    %21 = vector.load %arg6[%c0_8, %c0_9] : memref<128x128xbf16, #tpu.memory_space<vmem>>, vector<128x128xbf16>
    %cst_10 = arith.constant dense<0.000000e+00> : vector<8x128xf32>
    %22 = tpu.matmul %20, %21, %cst_10 {dimension_numbers = #tpu.dot_dimension_numbers<[1], [0], [0], [1], [0, 0, 1, 1], [], []>} : vector<8x128xbf16>, vector<128x128xbf16>, vector<8x128xf32> -> vector<8x128xf32>
    %c0_11 = arith.constant 0 : index
    %c0_12 = arith.constant 0 : index
    %23 = vector.load %arg7[%c0_11, %c0_12] : memref<1x128xf32, #tpu.memory_space<vmem>>, vector<1x128xf32>
    %24 = vector.broadcast %23 : vector<1x128xf32> to vector<8x128xf32>
    %25 = arith.addf %22, %24 : vector<8x128xf32>
    %c0_13 = arith.constant 0 : index
    %c0_14 = arith.constant 0 : index
    %26 = vector.load %arg8[%c0_13, %c0_14] : memref<8x128xf32, #tpu.memory_space<vmem>>, vector<8x128xf32>
    tpu.vector_store %arg8[%c0_13, %c0_14], %25 {strides = array<i32>} : memref<8x128xf32, #tpu.memory_space<vmem>>, vector<8x128xf32>,
    return
  }
  func.func @transform_0(%arg0: i32, %arg1: i32) -> (i32, i32) {
    %c0_i32 = arith.constant 0 : i32
    %c0_i32_0 = arith.constant 0 : i32
    return %arg0, %c0_i32 : i32, i32
  }
  func.func @transform_1(%arg0: i32, %arg1: i32) -> (i32, i32) {
    %c0_i32 = arith.constant 0 : i32
    %c0_i32_0 = arith.constant 0 : i32
    %c0_i32_1 = arith.constant 0 : i32
    return %c0_i32, %c0_i32_0 : i32, i32
  }
  func.func @transform_2(%arg0: i32, %arg1: i32) -> (i32, i32) {
    %c0_i32 = arith.constant 0 : i32
    %c0_i32_0 = arith.constant 0 : i32
    %c0_i32_1 = arith.constant 0 : i32
    return %c0_i32, %c0_i32_0 : i32, i32
  }
  func.func @transform_3(%arg0: i32, %arg1: i32) -> (i32, i32) {
    %c0_i32 = arith.constant 0 : i32
    %c0_i32_0 = arith.constant 0 : i32
    %c0_i32_1 = arith.constant 0 : i32
    return %c0_i32, %c0_i32_0 : i32, i32
  }
  func.func @transform_4(%arg0: i32, %arg1: i32) -> (i32, i32) {
    %c0_i32 = arith.constant 0 : i32
    %c0_i32_0 = arith.constant 0 : i32
    return %c0_i32, %arg1 : i32, i32
  }
  func.func @transform_5(%arg0: i32, %arg1: i32) -> (i32, i32) {
    %c0_i32 = arith.constant 0 : i32
    %c0_i32_0 = arith.constant 0 : i32
    return %c0_i32, %arg1 : i32, i32
  }
  func.func @transform_6(%arg0: i32, %arg1: i32) -> (i32, i32) {
    %c0_i32 = arith.constant 0 : i32
    return %arg0, %arg1 : i32, i32
  }
}

</mosaic_0001>

<bundles_post_ra>
// kernel: tpu_custom_call.1
= control target key start
LH: loop header
LB: loop body
LE: loop exit
PB: predicated region body
PF: predicated region fallthrough
CT: control target
= control target key end

     0   :  { %11 = vsyncpa [#allocation3], 0  ;;  %s1016_s0 = inlined_call_operand.vmem [shape: f32[8,1], index: 0, kind: input, shape index: {}]   ;;  %s1017_s1 = inlined_call_operand.vmem [shape: f32[1,128], index: 1, kind: input, shape index: {}]   ;;  %s1018_s2 = inlined_call_operand.hbm [shape: bf16[256,128], index: 2, kind: input, shape index: {}]   ;;  %s1019_s3 = inlined_call_operand.vmem [shape: f32[1,128], index: 3, kind: input, shape index: {}]   ;;  %s1020_s4 = inlined_call_operand.hbm [shape: bf16[128,128], index: 4, kind: input, shape index: {}]   ;;  %s1021_s5 = inlined_call_operand.vmem [shape: f32[1,128], index: 5, kind: input, shape index: {}]   ;;  %s1022_s6 = inlined_call_operand.hbm [shape: f32[8,128], index: 6, kind: output, shape index: {}]  }
   0x1   :  { %12 = vsyncpa [#allocation6], 0 }
   0x2   :  { %13 = vsyncpa [#allocation4], 0  ;;  %s22_s23 = sshll.u32 %s1018_s2, 4  ;;  %s886_s24 = smov [#allocation2]   ;;  %s23_s23 = int_to_ptr.hbm [resolvable:$true] %s22_s23 }
   0x3   :  { %s24_s25 = sshll.u32 %s886_s24, 4  ;;  %s37_s28 = sshll.u32 %s1020_s4, 4  ;;  %s25_s25 = int_to_ptr.vmem [resolvable:$true] %s24_s25  ;;  %s38_s28 = int_to_ptr.hbm [resolvable:$true] %s37_s28 }
   0x4   :  { %s887_s29 = smov 64   ;;  %s888_s30 = smov 4  }
   0x5   :  { %30 = dma.hbm_to_vmem [thread:$0]  %s23_s23, 2048, %s25_s25, [#allocation3], %s887_s29, %s887_s29, %s888_s30  }
   0x6   :  { %s889_s7 = smov [#allocation5]  }
   0x7   :  { %s39_s8 = sshll.u32 %s889_s7, 4  ;;  %s40_s8 = int_to_ptr.vmem [resolvable:$true] %s39_s8 }
   0x8   :  { %45 = dma.hbm_to_vmem [thread:$0]  %s38_s28, 1024, %s40_s8, [#allocation6], %s887_s29, %s887_s29, %s888_s30  }
   0x9   :  { %880 = dma.done.wait [#allocation3], 2048  }
   0xa   :  { %881 = vsyncadd [#allocation3], 4294965248 }
   0xb   :  { %882 = dma.done.wait [#allocation6], 1024  }
   0xc   :  { %883 = vsyncadd [#allocation6], 4294966272  ;;  %v890_v0 = vmov 0   ;;  %v57_v1 = vld [vmem:[%s1016_s0] sm:$0xff]  ;;  %v768_v2 = vld [vmem:[#allocation2 + $0x38] sm:$0xff]  ;;  %s898_s12 = smov [#allocation7]  }
   0xd   :  { %798 = vset.pattern.permute.xlu0 %v890_v0  ;;  %v776_v3 = vld [vmem:[#allocation2 + $0x78] sm:$0xff]  ;;  %511 = vmatpush.bf16.msra.mxu0 %v768_v2  ;;  %v767_v4 = vld [vmem:[#allocation2 + $0x30] sm:$0xff]  ;;  %v799_v6 = vld [vmem:[%s1017_s1] ss:$0 sm:$0xff]  ;;  %v891_v30 = vmov 683565275  }
   0xe   :  { %61 = vperm.xlu0 %798, %v57_v1   ;;  %524 = vmatpush.bf16.msra.mxu1 %v776_v3  ;;  %v775_v5 = vld [vmem:[#allocation2 + $0x70] sm:$0xff]  ;;  %v766_v7 = vld [vmem:[#allocation2 + $0x28] sm:$0xff]  ;;  %v765_v11 = vld [vmem:[#allocation2 + $0x20] sm:$0xff]  ;;  %v892_v32 = vmov 2475754826   ;;  %s646_s13 = sshll.u32 %s898_s12, 4  ;;  %s647_s13 = int_to_ptr.vmem [resolvable:$true] %s646_s13 }
   0xf   :  { %v774_v8 = vld [vmem:[#allocation2 + $0x68] sm:$0xff]  ;;  %v773_v12 = vld [vmem:[#allocation2 + $0x60] sm:$0xff]  ;;  %v764_v15 = vld [vmem:[#allocation2 + $0x18] sm:$0xff]  ;;  %v893_v34 = vmov 2131351028   ;;  %s648_s16 = sshll.u32 %s1022_s6, 4  ;;  %s649_s16 = int_to_ptr.hbm [resolvable:$true] %s648_s16 }
  0x10   :  { %v772_v16 = vld [vmem:[#allocation2 + $0x58] sm:$0xff]  ;;  %v763_v20 = vld [vmem:[#allocation2 + $0x10] sm:$0xff]  ;;  %v762_v25 = vld [vmem:[#allocation2 + $0x8] sm:$0xff]  ;;  %v894_v36 = vmov 2102212464  }
  0x11   :  { %512 = vmatpush.bf16.msra.mxu0 %v767_v4  ;;  %v771_v21 = vld [vmem:[#allocation2 + $0x50] sm:$0xff]  ;;  %v770_v27 = vld [vmem:[#allocation2 + $0x48] sm:$0xff]  ;;  %v895_v41 = vmov 920167782   ;;  %v761_v43 = vld [vmem:[#allocation2] sm:$0xff] }
  0x12   :  { %525 = vmatpush.bf16.msra.mxu1 %v775_v5  ;;  %v896_v45 = vmov 1326507024   ;;  %v769_v48 = vld [vmem:[#allocation2 + $0x40] sm:$0xff] }
  0x15   :  { %513 = vmatpush.bf16.msra.mxu0 %v766_v7 }
  0x16   :  { %526 = vmatpush.bf16.msra.mxu1 %v774_v8 }
  0x19   :  { %514 = vmatpush.bf16.msra.mxu0 %v765_v11 }
  0x1a   :  { %527 = vmatpush.bf16.msra.mxu1 %v773_v12 }
  0x1d   :  { %515 = vmatpush.bf16.msra.mxu0 %v764_v15 }
  0x1e   :  { %528 = vmatpush.bf16.msra.mxu1 %v772_v16 }
  0x21   :  { %516 = vmatpush.bf16.msra.mxu0 %v763_v20 }
  0x22   :  { %529 = vmatpush.bf16.msra.mxu1 %v771_v21 }
  0x25   :  { %517 = vmatpush.bf16.msra.mxu0 %v762_v25 }
  0x26   :  { %530 = vmatpush.bf16.msra.mxu1 %v770_v27 }
  0x29   :  { %518 = vmatpush.bf16.msra.mxu0 %v761_v43 }
  0x2a   :  { %531 = vmatpush.bf16.msra.mxu1 %v769_v48 }
  0x80   :  { %v62_v9 = vpop.permute.xlu0 %61 }
  0x81   :  { %v947_v10 = vmul.f32 %v799_v6, %v62_v9 }
  0x83   :  { %v71_v13 = vand.u32 2139095040, %v947_v10  ;;  %v68_v17 = vand.u32 2147483647, %v947_v10  ;;  %vm70_vm12 = vcmp.lt.s32.totalorder %v947_v10, 0 }
  0x85   :  { %v72_v14 = vshrl.u32 %v71_v13, 23  ;;  %v75_v22 = vand.u32 8388607, %v68_v17  ;;  %vm69_vm13 = vcmp.le.f32.partialorder %v68_v17, 0.7853982 }
  0x87   :  { %v659_v18 = vadd.s32 4294967169, %v72_v14  ;;  %v76_v26 = vor.u32 8388608, %v75_v22 }
  0x89   :  { %v78_v19 = vadd.s32 1, %v659_v18  ;;  %v963_v47 = vshll.u32 %v76_v26, 8 }
  0x8b   :  { %vm79_vm0 = vcmp.gt.s32.totalorder %v78_v19, 0  ;;  %v117_v60 = vand.u32 65535, %v963_v47  ;;  %v118_v62 = vshrl.u32 %v963_v47, 16 }
  0x8c   :  { %v80_v23 = vsel %vm79_vm0, %v78_v19, 0 }
  0x8d   :  { %v82_v24 = vand.u32 31, %v80_v23  ;;  %v953_v28 = vshrl.u32 %v80_v23, 5 }
  0x8f   :  { %v955_v29 = vsub.s32 32, %v82_v24  ;;  %v85_v31 = vshll.u32 %v891_v30, %v82_v24  ;;  %v88_v33 = vshll.u32 %v892_v32, %v82_v24  ;;  %v91_v35 = vshll.u32 %v893_v34, %v82_v24 }
  0x90   :  { %v94_v37 = vshll.u32 %v894_v36, %v82_v24  ;;  %v97_v44 = vshll.u32 %v895_v41, %v82_v24  ;;  %vm100_vm1 = vcmp.lt.s32.totalorder %v953_v28, 1  ;;  %vm103_vm2 = vcmp.lt.s32.totalorder %v953_v28, 4 }
  0x91   :  { %v86_v38 = vshrl.u32 %v892_v32, %v955_v29  ;;  %v89_v39 = vshrl.u32 %v893_v34, %v955_v29  ;;  %v92_v40 = vshrl.u32 %v894_v36, %v955_v29  ;;  %v95_v42 = vshrl.u32 %v895_v41, %v955_v29 }
  0x92   :  { %v98_v46 = vshrl.u32 %v896_v45, %v955_v29  ;;  %vm102_vm3 = vcmp.lt.s32.totalorder %v953_v28, 3  ;;  %vm101_vm4 = vcmp.lt.s32.totalorder %v953_v28, 2  ;;  %v84_v25 = vshrl.u32 %v891_v30, %v955_v29 }
  0x93   :  { %v87_v49 = vor.u32 %v86_v38, %v85_v31  ;;  %v90_v50 = vor.u32 %v89_v39, %v88_v33  ;;  %v93_v51 = vor.u32 %v92_v40, %v91_v35  ;;  %v96_v52 = vor.u32 %v95_v42, %v94_v37 }
  0x94   :  { %v99_v53 = vor.u32 %v98_v46, %v97_v44 }
  0x95   :  { %v108_v54 = vsel %vm100_vm1, %v87_v49, %v90_v50  ;;  %v109_v55 = vsel %vm103_vm2, %v96_v52, 920167782  ;;  %v112_v56 = vsel %vm100_vm1, %v90_v50, %v93_v51  ;;  %v105_v22 = vsel %vm103_vm2, %v93_v51, 2102212464 }
  0x96   :  { %v110_v57 = vsel %vm102_vm3, %v93_v51, %v109_v55  ;;  %v113_v58 = vsel %vm103_vm2, %v99_v53, 1326507024  ;;  %v104_v34 = vsel %vm100_vm1, %v84_v25, %v87_v49  ;;  %v106_v35 = vsel %vm102_vm3, %v90_v50, %v105_v22 }
  0x97   :  { %v114_v59 = vsel %vm102_vm3, %v96_v52, %v113_v58  ;;  %v111_v61 = vsel %vm101_vm4, %v108_v54, %v110_v57  ;;  %v107_v30 = vsel %vm101_vm4, %v104_v34, %v106_v35 }
  0x98   :  { %v115_v63 = vsel %vm101_vm4, %v112_v56, %v114_v59  ;;  %v141_v1 = vand.u32 65535, %v111_v61  ;;  %v142_v2 = vshrl.u32 %v111_v61, 16  ;;  %v161_v44 = vmul.u32 %v963_v47, %v107_v30 }
  0x99   :  { %v119_v3 = vand.u32 65535, %v115_v63  ;;  %v120_v4 = vshrl.u32 %v115_v63, 16  ;;  %vm211_vm4 = vweird.f32 %v947_v10 }
  0x9a   :  { %v144_v5 = vmul.u32 %v142_v2, %v117_v60  ;;  %v145_v6 = vmul.u32 %v141_v1, %v118_v62  ;;  %v143_v9 = vmul.u32 %v141_v1, %v117_v60  ;;  %v146_v14 = vmul.u32 %v142_v2, %v118_v62 }
  0x9b   :  { %v122_v7 = vmul.u32 %v120_v4, %v117_v60  ;;  %v123_v8 = vmul.u32 %v119_v3, %v118_v62  ;;  %v121_v12 = vmul.u32 %v119_v3, %v117_v60  ;;  %v124_v15 = vmul.u32 %v120_v4, %v118_v62 }
  0x9c   :  { %v147_v11 = vshll.u32 %v144_v5, 16  ;;  %v149_v16 = vshll.u32 %v145_v6, 16  ;;  %v148_v32 = vshrl.u32 %v144_v5, 16  ;;  %v150_v38 = vshrl.u32 %v145_v6, 16 }
  0x9d   :  { %v125_v13 = vshll.u32 %v122_v7, 16  ;;  %v127_v19 = vshll.u32 %v123_v8, 16  ;;  %v126_v36 = vshrl.u32 %v122_v7, 16  ;;  %v128_v40 = vshrl.u32 %v123_v8, 16 }
  0x9e   :  { %vm151_vm5 = vc.u32 %v143_v9, %v147_v11  ;;  %v153_v18 = vadd.s32 %v147_v11, %v143_v9 }
  0x9f   :  { %vm129_vm6 = vc.u32 %v121_v12, %v125_v13  ;;  %v131_v20 = vadd.s32 %v125_v13, %v121_v12  ;;  %v152_v21 = vsel %vm151_vm5, 1, %v890_v0 }
  0xa0   :  { %v130_v23 = vsel %vm129_vm6, 1, %v890_v0  ;;  %v154_v24 = vadd.s32 %v152_v21, %v146_v14  ;;  %vm155_vm7 = vc.u32 %v153_v18, %v149_v16 }
  0xa1   :  { %v132_v26 = vadd.s32 %v130_v23, %v124_v15  ;;  %vm133_vm8 = vc.u32 %v131_v20, %v127_v19  ;;  %v156_v27 = vsel %vm155_vm7, 1, %v890_v0 }
  0xa2   :  { %v134_v31 = vsel %vm133_vm8, 1, %v890_v0  ;;  %v158_v33 = vadd.s32 %v156_v27, %v154_v24  ;;  %v157_v0 = vadd.s32 %v153_v18, %v149_v16 }
  0xa3   :  { %v136_v37 = vadd.s32 %v134_v31, %v132_v26 }
  0xa4   :  { %v159_v39 = vadd.s32 %v158_v33, %v148_v32 }
  0xa5   :  { %v137_v29 = vadd.s32 %v136_v37, %v126_v36 }
  0xa6   :  { %v160_v41 = vadd.s32 %v159_v39, %v150_v38 }
  0xa7   :  { %v138_v42 = vadd.s32 %v137_v29, %v128_v40 }
  0xa8   :  { %v164_v43 = vadd.s32 1, %v160_v41 }
  0xa9   :  { %vm163_vm9 = vc.u32 %v138_v42, %v157_v0  ;;  %v162_v56 = vadd.s32 %v157_v0, %v138_v42  ;;  %v783_v42 = vld [vmem:[#allocation5 + $0x30] sm:$0xff]  ;;  %v782_v0 = vld [vmem:[#allocation5 + $0x28] sm:$0xff] }
  0xaa   :  { %v165_v45 = vsel %vm163_vm9, %v164_v43, %v160_v41  ;;  %v784_v41 = vld [vmem:[#allocation5 + $0x38] sm:$0xff]  ;;  %v800_v43 = vld [vmem:[%s1019_s3] ss:$0 sm:$0xff] }
  0xab   :  { %v166_v46 = vadd.s32 %v165_v45, %v161_v44  ;;  %627 = vmatpush.bf16.msra.mxu2 %v784_v41  ;;  %v781_v44 = vld [vmem:[#allocation5 + $0x20] sm:$0xff] }
  0xad   :  { %v167_v48 = vadd.s32 536870912, %v166_v46 }
  0xaf   :  { %v168_v49 = vshrl.u32 %v167_v48, 30  ;;  %628 = vmatpush.bf16.msra.mxu2 %v783_v42 }
  0xb1   :  { %v169_v50 = vshll.u32 %v168_v49, 30  ;;  %v192_v6 = vsub.s32 4, %v168_v49 }
  0xb3   :  { %v170_v51 = vsub.s32 %v166_v46, %v169_v50  ;;  %v193_v12 = vsel %vm70_vm12, %v192_v6, %v168_v49  ;;  %629 = vmatpush.bf16.msra.mxu2 %v782_v0  ;;  %v779_v50 = vld [vmem:[#allocation5 + $0x10] sm:$0xff] }
  0xb4   :  { %v195_v15 = vsel %vm69_vm13, 0, %v193_v12 }
  0xb5   :  { %vm171_vm10 = vcmp.lt.s32.totalorder %v170_v51, 0  ;;  %v172_v52 = vsub.s32 0, %v170_v51  ;;  %v366_v21 = vadd.s32 3, %v195_v15  ;;  %v212_v25 = vand.u32 3, %v195_v15 }
  0xb7   :  { %v173_v53 = vsel %vm171_vm10, %v172_v52, %v170_v51  ;;  %v367_v26 = vand.u32 3, %v366_v21  ;;  %vm213_vm14 = vcmp.lt.s32.totalorder %v212_v25, 2  ;;  %vm214_vm15 = vcmp.eq.s32.totalorder %v212_v25, 0  ;;  %630 = vmatpush.bf16.msra.mxu2 %v781_v44 }
  0xb8   :  { %v174_v54 = vclz %v173_v53  ;;  %vm217_vm0 = vcmp.eq.s32.totalorder %v212_v25, 2  ;;  %v778_v53 = vld [vmem:[#allocation5 + $0x8] sm:$0xff] }
  0xb9   :  { %vm368_vm1 = vcmp.lt.s32.totalorder %v367_v26, 2  ;;  %vm369_vm2 = vcmp.eq.s32.totalorder %v367_v26, 0  ;;  %vm372_vm3 = vcmp.eq.s32.totalorder %v367_v26, 2 }
  0xba   :  { %v660_v55 = vadd.s32 4294967294, %v174_v54 }
  0xbc   :  { %vm661_vm11 = vcmp.lt.s32.totalorder %v660_v55, 0 }
  0xbd   :  { %v177_v28 = vsel %vm661_vm11, 0, %v660_v55 }
  0xbe   :  { %v178_v57 = vsub.s32 32, %v177_v28  ;;  %v182_v58 = vsub.s32 4294967266, %v177_v28  ;;  %v179_v59 = vshll.u32 %v170_v51, %v177_v28 }
  0xc0   :  { %v180_v60 = vshrl.u32 %v162_v56, %v178_v57  ;;  %v183_v47 = vadd.s32 127, %v182_v58  ;;  %v777_v57 = vld [vmem:[#allocation5] sm:$0xff] }
  0xc2   :  { %v181_v61 = vor.u32 %v180_v60, %v179_v59  ;;  %v184_v62 = vshll.u32 %v183_v47, 23 }
  0xc4   :  { %v185_v63 = vor.u32 4788187, %v184_v62  ;;  %v188_v2 = vcvt.s32.f32 %v181_v61 }
  0xc6   :  { %v186_v1 = vand.u32 2147483647, %v185_v63 }
  0xc8   :  { %v189_v3 = vmul.f32 %v188_v2, %v186_v1  ;;  %v897_v1 = vmov 1065369472  }
  0xc9   :  { %v546_v2 = vunpack.c.h.bf16 %v897_v1 }
  0xca   :  { %v190_v4 = vxor.u32 2147483648, %v189_v3 }
  0xcc   :  { %v191_v5 = vsel %vm70_vm12, %v190_v4, %v189_v3  ;;  %v547_v3 = vunpack.c.l.bf16 %v897_v1 }
  0xcd   :  { %v194_v7 = vsel %vm69_vm13, %v947_v10, %v191_v5  ;;  %v780_v10 = vld [vmem:[#allocation5 + $0x18] sm:$0xff] }
  0xce   :  { %v196_v8 = vmul.f32 %v194_v7, %v194_v7  ;;  %631 = vmatpush.bf16.msra.mxu2 %v780_v10 }
  0xd0   :  { %v197_v9 = vmul.f32 -0.001358992, %v196_v8  ;;  %v204_v11 = vmul.f32 -0.00019511016, %v196_v8 }
  0xd2   :  { %v198_v13 = vadd.f32 0.041655596, %v197_v9  ;;  %v205_v14 = vadd.f32 0.008332121, %v204_v11  ;;  %632 = vmatpush.bf16.msra.mxu2 %v779_v50 }
  0xd4   :  { %v199_v16 = vmul.f32 %v198_v13, %v196_v8  ;;  %v206_v18 = vmul.f32 %v205_v14, %v196_v8  ;;  %v801_v14 = vld [vmem:[%s1021_s5] ss:$0 sm:$0xff] }
  0xd6   :  { %v200_v19 = vadd.f32 -0.4999988, %v199_v16  ;;  %v207_v20 = vadd.f32 -0.16666654, %v206_v18  ;;  %633 = vmatpush.bf16.msra.mxu2 %v778_v53 }
  0xd8   :  { %v201_v22 = vmul.f32 %v200_v19, %v196_v8  ;;  %v208_v23 = vmul.f32 %v207_v20, %v196_v8 }
  0xda   :  { %v202_v24 = vadd.f32 1.0, %v201_v22  ;;  %v209_v17 = vadd.f32 1.0, %v208_v23  ;;  %634 = vmatpush.bf16.msra.mxu2 %v777_v57 }
  0xdc   :  { %v210_v27 = vmul.f32 %v209_v17, %v194_v7  ;;  %v218_v31 = vxor.u32 2147483648, %v202_v24 }
  0xde   :  { %v215_v32 = vxor.u32 2147483648, %v210_v27  ;;  %v219_v34 = vsel %vm217_vm0, %v218_v31, %v210_v27  ;;  %v374_v36 = vsel %vm372_vm3, %v218_v31, %v210_v27 }
  0xe0   :  { %v216_v33 = vsel %vm214_vm15, %v202_v24, %v215_v32  ;;  %v371_v35 = vsel %vm369_vm2, %v202_v24, %v215_v32 }
  0xe1   :  { %v220_v37 = vsel %vm213_vm14, %v216_v33, %v219_v34  ;;  %v375_v38 = vsel %vm368_vm1, %v371_v35, %v374_v36 }
  0xe2   :  { %v221_v39 = vsel %vm211_vm4, nan, %v220_v37  ;;  %v376_v40 = vsel %vm211_vm4, nan, %v375_v38 }
  0xe3   :  { %v377_v29 = vpack.c.bf16 %v221_v39, %v221_v39  ;;  %v378_v30 = vpack.c.bf16 %v376_v40, %v376_v40 }
  0xe5   :  { %519 = vmatmul.bf16.vlgmr.msra.gmra.mxu0 %v377_v29  ;;  %532 = vmatmul.bf16.vlgmr.msra.gmra.mxu1 %v378_v30 }
 0x162   :  { %v520_v45 = vpop.f32.mrf.mxu0  ;;  %v533_v46 = vpop.f32.mrf.mxu1 }
 0x163   :  { %v521_v48 = vadd.f32 %v800_v43, %v520_v45 }
 0x165   :  { %v534_v49 = vadd.f32 %v533_v46, %v521_v48 }
 0x167   :  { %v537_v51 = vpack.c.bf16 %v534_v49, %v534_v49 }
 0x169   :  { %v538_v52 = vxor.u32 2147516416, %v537_v51  ;;  %v555_v9 = vunpack.c.l.bf16 %v537_v51 }
 0x16a   :  { %v522_v54 = vpop.f32.mrf.mxu0  ;;  %v535_v55 = vpop.f32.mrf.mxu1 }
 0x16b   :  { %v539_v28 = vunpack.c.l.bf16 %v538_v52 }
 0x16d   :  { %v540_v56 = vmul.f32 1.442695, %v539_v28 }
 0x16f   :  { %802 = vpow2.f32 %v540_v56 }
 0x175   :  { %v803_v58 = vpop.eup %802 }
 0x176   :  { %v542_v59 = vpack.c.bf16 %v803_v58, %v803_v58 }
 0x178   :  { %v543_v60 = vunpack.c.l.bf16 %v542_v59 }
 0x17a   :  { %v544_v47 = vadd.f32 1.0, %v543_v60 }
 0x17c   :  { %v545_v61 = vpack.c.bf16 %v544_v47, %v544_v47 }
 0x17e   :  { %v548_v62 = vunpack.c.h.bf16 %v545_v61  ;;  %v549_v63 = vunpack.c.l.bf16 %v545_v61 }
 0x180   :  { %804 = vrcp.f32 %v548_v62 }
 0x181   :  { %806 = vrcp.f32 %v549_v63 }
 0x186   :  { %v805_v4 = vpop.eup %804 }
 0x187   :  { %v807_v5 = vpop.eup %806  ;;  %v551_v6 = vmul.f32 %v805_v4, %v546_v2 }
 0x188   :  { %v553_v7 = vmul.f32 %v807_v5, %v547_v3 }
 0x18a   :  { %v554_v8 = vpack.c.bf16 %v551_v6, %v553_v7 }
 0x18c   :  { %v556_v11 = vunpack.c.l.bf16 %v554_v8 }
 0x18e   :  { %v557_v12 = vmul.f32 %v556_v11, %v555_v9 }
 0x190   :  { %v558_v13 = vpack.c.bf16 %v557_v12, %v557_v12 }
 0x192   :  { %635 = vmatmul.bf16.vlgmr.msra.gmra.mxu2 %v558_v13 }
 0x215   :  { %v636_v15 = vpop.f32.mrf.mxu2 }
 0x216   :  { %v637_v16 = vadd.f32 %v801_v14, %v636_v15 }
 0x218   :  { %640 = vst [vmem:[#allocation7] sm:$0xff] %v637_v16 }
 0x219   :  { %651 = dma.vmem_to_hbm [thread:$0]  %s647_s13, 128, %s649_s16, [#allocation4]  }
 0x21d   :  { %v638_v18 = vpop.f32.mrf.mxu2 }
 0x21e   :  { %884 = dma.done.wait [#allocation4], 128  }
 0x21f   :  { %885 = vsyncadd [#allocation4], 4294967168 }
 0x220   :  { %656 = vsyncpa [#allocation3], 1 }
 0x221   :  { %657 = vsyncpa [#allocation6], 1 }
 0x222   :  { %658 = vsyncpa [#allocation4], 1 }

</bundles_post_ra>
